<compile_context>
chip_gen: v6e
topology: v6e:2x2x1
jax: 0.10.0
libtpu: 0.0.40
codegen_flags: <defaults>
</compile_context>

<pallas_src>
import jax
import jax.numpy as jnp
from jax.experimental import pallas as pl
from jax.experimental.pallas import tpu as pltpu

EPS = 1e-5          # nn.BatchNorm2d default eps
_NUM_CORES = 2      # v7x megacore split of phase A; serial (harmless) on v5e/v6e
_VMEM_LIMIT = 32 * 1024 * 1024


def _round_up(a, b):
    return (a + b - 1) // b * b


def _matmul_stats_kernel(p_ref, w_ref, y_ref, sum_ref, sumsq_ref, acc_ref):
    # grid = (core, m_tile, k_tile); k is innermost (fastest).
    # p_ref: [TM, TK] (bf16/f32), w_ref: [TK, OC_pad]
    # y_ref: [TM, OC_pad] f32 conv-output tile (written only at last k)
    # sum_ref/sumsq_ref: [1, 8, OC_pad] f32 per-core accumulators (revisited)
    # acc_ref: VMEM [TM, OC_pad] f32 contraction accumulator
    i = pl.program_id(1)
    k = pl.program_id(2)
    nk = pl.num_programs(2)

    @pl.when(k == 0)
    def _zero_acc():
        acc_ref[...] = jnp.zeros_like(acc_ref)

    acc_ref[...] += jnp.dot(p_ref[...], w_ref[...],
                            preferred_element_type=jnp.float32)

    @pl.when(jnp.logical_and(i == 0, k == nk - 1))
    def _zero_stats():
        sum_ref[...] = jnp.zeros_like(sum_ref)
        sumsq_ref[...] = jnp.zeros_like(sumsq_ref)

    @pl.when(k == nk - 1)
    def _finalize_tile():
        y = acc_ref[...]
        y_ref[...] = y
        s = jnp.sum(y, axis=0, keepdims=True)            # (1, OC_pad)
        sq = jnp.sum(y * y, axis=0, keepdims=True)       # (1, OC_pad)
        # Broadcast across the 8 sublane rows of the stats block (rows equal).
        # Note: E[y^2]-E[y]^2 in f32 can cancel for |mean|>>std; clamped in glue.
        sum_ref[...] += s[None]
        sumsq_ref[...] += sq[None]


def _normalize_kernel(y_ref, scale_ref, shift_ref, o_ref):
    # Fused BN apply: single multiply-add per element (scale/shift per channel).
    o_ref[...] = (y_ref[...] * scale_ref[...] + shift_ref[...]).astype(o_ref.dtype)


def conv_bn(x, weight, gamma, beta, stride=1, padding=0, dilation=1, groups=1,
            tm=256, tk=512, compute_dtype=jnp.bfloat16):
    """ConvBN forward (deploy=False path: conv w/o bias + training-mode BN).

    x: [N, C, H, W] f32, weight: [OC, C, KH, KW] f32, gamma/beta: [OC] f32.
    Returns NCHW f32 output.
    """
    if groups != 1:
        raise NotImplementedError("groups != 1 not supported")

    N, C, H, W = x.shape
    OC, _, KH, KW = weight.shape
    OH = (H + 2 * padding - dilation * (KH - 1) - 1) // stride + 1
    OW = (W + 2 * padding - dilation * (KW - 1) - 1) // stride + 1
    M = N * OH * OW
    Kd = C * KH * KW

    # --- glue: im2col (pure reshaping / slicing, no FLOPs) ---
    xp = jnp.pad(x, ((0, 0), (0, 0), (padding, padding), (padding, padding)))
    taps = []
    for kh in range(KH):
        for kw in range(KW):
            hs, ws = kh * dilation, kw * dilation
            taps.append(xp[:, :, hs:hs + (OH - 1) * stride + 1:stride,
                           ws:ws + (OW - 1) * stride + 1:stride])
    # (KH, KW, N, C, OH, OW) -> (N, OH, OW, C, KH, KW) -> [M, Kd]
    pstack = jnp.stack(taps, axis=0).reshape(KH, KW, N, C, OH, OW)
    pmat = jnp.transpose(pstack, (2, 4, 5, 3, 0, 1)).reshape(M, Kd)
    wmat = jnp.transpose(weight.reshape(OC, Kd))  # [Kd, OC]

    # --- tile sizing: lane-dense 128-multiple channel dims, K-tiled contraction ---
    OC_pad = _round_up(OC, 128)
    TK = _round_up(min(tk, Kd), 128)
    Kd_pad = _round_up(Kd, TK)
    nk = Kd_pad // TK
    TM = _round_up(min(tm, max(1, -(-M // _NUM_CORES))), 8)
    M_pad = _round_up(M, _NUM_CORES * TM)
    n_per_core = M_pad // (_NUM_CORES * TM)
    n_tiles = M_pad // TM

    pmat = jnp.pad(pmat, ((0, M_pad - M), (0, Kd_pad - Kd))).astype(compute_dtype)
    wmat = jnp.pad(wmat, ((0, Kd_pad - Kd), (0, OC_pad - OC))).astype(compute_dtype)

    # --- phase A: megacore-split, K-tiled conv matmul + streaming channel stats ---
    y, ch_sum, ch_sumsq = pl.pallas_call(
        _matmul_stats_kernel,
        out_shape=(
            jax.ShapeDtypeStruct((M_pad, OC_pad), jnp.float32),
            jax.ShapeDtypeStruct((_NUM_CORES, 8, OC_pad), jnp.float32),
            jax.ShapeDtypeStruct((_NUM_CORES, 8, OC_pad), jnp.float32),
        ),
        grid=(_NUM_CORES, n_per_core, nk),
        in_specs=[
            pl.BlockSpec((TM, TK), lambda c, i, k: (c * n_per_core + i, k)),
            pl.BlockSpec((TK, OC_pad), lambda c, i, k: (k, 0)),
        ],
        out_specs=(
            pl.BlockSpec((TM, OC_pad), lambda c, i, k: (c * n_per_core + i, 0)),
            pl.BlockSpec((1, 8, OC_pad), lambda c, i, k: (c, 0, 0)),
            pl.BlockSpec((1, 8, OC_pad), lambda c, i, k: (c, 0, 0)),
        ),
        scratch_shapes=[pltpu.VMEM((TM, OC_pad), jnp.float32)],
        compiler_params=pltpu.CompilerParams(
            dimension_semantics=("parallel", "arbitrary", "arbitrary"),
            vmem_limit_bytes=_VMEM_LIMIT),
    )(pmat, wmat)

    # --- glue: per-channel finalize (O(OC); padded rows/channels contributed 0) ---
    total_sum = jnp.sum(ch_sum[:, 0, :], axis=0)        # (OC_pad,)
    total_sumsq = jnp.sum(ch_sumsq[:, 0, :], axis=0)
    mean = total_sum / M
    var = jnp.maximum(total_sumsq / M - mean * mean, 0.0)   # biased var (BN training)
    inv = jax.lax.rsqrt(var + EPS)
    gamma_p = jnp.pad(gamma.astype(jnp.float32), (0, OC_pad - OC))
    beta_p = jnp.pad(beta.astype(jnp.float32), (0, OC_pad - OC))
    scale = (gamma_p * inv).reshape(1, OC_pad)
    shift = (beta_p - mean * gamma_p * inv).reshape(1, OC_pad)

    # --- phase B: fused normalize, in-place on y, megacore-parallel ---
    out = pl.pallas_call(
        _normalize_kernel,
        out_shape=jax.ShapeDtypeStruct((M_pad, OC_pad), jnp.float32),
        grid=(n_tiles,),
        in_specs=[
            pl.BlockSpec((TM, OC_pad), lambda i: (i, 0)),
            pl.BlockSpec((1, OC_pad), lambda i: (0, 0),
                         pipeline_mode=pl.Buffered(1)),
            pl.BlockSpec((1, OC_pad), lambda i: (0, 0),
                         pipeline_mode=pl.Buffered(1)),
        ],
        out_specs=pl.BlockSpec((TM, OC_pad), lambda i: (i, 0)),
        input_output_aliases={0: 0},
        compiler_params=pltpu.CompilerParams(
            dimension_semantics=("parallel",),
            vmem_limit_bytes=_VMEM_LIMIT),
    )(y, scale, shift)

    # [M_pad, OC_pad] -> [M, OC] -> [N, OH, OW, OC] -> NCHW
    out = out[:M, :OC].reshape(N, OH, OW, OC)
    return jnp.transpose(out, (0, 3, 1, 2))


def _reference(x, weight, gamma, beta, stride, padding, dilation=1):
    y = jax.lax.conv_general_dilated(
        x, weight, window_strides=(stride, stride),
        padding=[(padding, padding), (padding, padding)],
        rhs_dilation=(dilation, dilation),
        dimension_numbers=("NCHW", "OIHW", "NCHW"))
    mean = jnp.mean(y, axis=(0, 2, 3), keepdims=True)
    var = jnp.mean((y - mean) ** 2, axis=(0, 2, 3), keepdims=True)
    return (y - mean) * jax.lax.rsqrt(var + EPS) * gamma.reshape(1, -1, 1, 1) \
        + beta.reshape(1, -1, 1, 1)


def _make_inputs(key, N, C, H, W, OC, KH, KW):
    kx, kw, kg, kb = jax.random.split(key, 4)
    x = jax.random.normal(kx, (N, C, H, W), dtype=jnp.float32)
    bound = 1.0 / ((C * KH * KW) ** 0.5)
    weight = jax.random.uniform(kw, (OC, C, KH, KW), jnp.float32, -bound, bound)
    gamma = 1.0 + 0.2 * jax.random.normal(kg, (OC,), jnp.float32)
    beta = 0.1 * jax.random.normal(kb, (OC,), jnp.float32)
    return x, weight, gamma, beta


if __name__ == "__main__":
    key = jax.random.PRNGKey(0)
    k1, k2 = jax.random.split(key, 2)

    # Test 1: ConvBN(4, 8, 3, stride=1, padding=1), bf16 MXU operands (default
    # fast path).  tm=128 => 2 row tiles per core: exercises the megacore split
    # and cross-tile statistics accumulation.
    N, C, H, W, OC = 2, 4, 16, 16, 8
    x, w, g, b = _make_inputs(k1, N, C, H, W, OC, 3, 3)
    ref = _reference(x, w, g, b, stride=1, padding=1)
    fn = jax.jit(lambda x, w, g, b: conv_bn(x, w, g, b, stride=1, padding=1, tm=128))
    out = jax.block_until_ready(fn(x, w, g, b))
    assert out.shape == (N, OC, H, W), out.shape
    assert jnp.allclose(out, ref, atol=5e-2, rtol=5e-2), \
        float(jnp.max(jnp.abs(out - ref)))

    # Test 2: ConvBN(32, 24, 3, stride=2, padding=2, dilation=2), f32 operands,
    # tk=128 => 3 contraction tiles: exercises the K-tiled VMEM accumulator.
    N2, C2, H2, W2, OC2 = 2, 32, 16, 16, 24
    x2, w2, g2, b2 = _make_inputs(k2, N2, C2, H2, W2, OC2, 3, 3)
    ref2 = _reference(x2, w2, g2, b2, stride=2, padding=2, dilation=2)
    fn2 = jax.jit(lambda x, w, g, b: conv_bn(x, w, g, b, stride=2, padding=2,
                                             dilation=2, tk=128,
                                             compute_dtype=jnp.float32))
    out2 = jax.block_until_ready(fn2(x2, w2, g2, b2))
    assert out2.shape == ref2.shape, out2.shape
    assert jnp.allclose(out2, ref2, atol=1e-4, rtol=1e-4), \
        float(jnp.max(jnp.abs(out2 - ref2)))

    print("KERNEL_OK")
</pallas_src>

<mosaic_0001>
module attributes {stable_mosaic.version = 11 : i64} {
  func.func @_matmul_stats_kernel(%arg0: i32, %arg1: i32, %arg2: i32, %arg3: memref<128x128xbf16, #tpu.memory_space<vmem>>, %arg4: memref<128x128xbf16, #tpu.memory_space<vmem>>, %arg5: memref<128x128xf32, #tpu.memory_space<vmem>>, %arg6: memref<1x8x128xf32, #tpu.memory_space<vmem>>, %arg7: memref<1x8x128xf32, #tpu.memory_space<vmem>>, %arg8: memref<128x128xf32, #tpu.memory_space<vmem>>) attributes {dimension_semantics = [#tpu.dimension_semantics<parallel>, #tpu.dimension_semantics<arbitrary>, #tpu.dimension_semantics<arbitrary>], iteration_bounds = array<i64: 2, 2, 1>, scalar_prefetch = 0 : i64, scratch_operands = 1 : i64, tpu.core_type = #tpu.core_type<tc>, window_params = [{transform_indices = @transform_0, window_bounds = array<i64: 128, 128>}, {transform_indices = @transform_1, window_bounds = array<i64: 128, 128>}, {transform_indices = @transform_2, window_bounds = array<i64: 128, 128>}, {transform_indices = @transform_3, window_bounds = array<i64: 1, 8, 128>}, {transform_indices = @transform_4, window_bounds = array<i64: 1, 8, 128>}]} {
    %c0_i32 = arith.constant 0 : i32
    %0 = arith.cmpi eq, %arg2, %c0_i32 : i32
    %1 = arith.extui %0 : i1 to i32
    %c0_i32_0 = arith.constant 0 : i32
    %2 = arith.cmpi ne, %1, %c0_i32_0 : i32
    scf.if %2 {
      %cst_13 = arith.constant 0.000000e+00 : f32
      %17 = vector.broadcast %cst_13 : f32 to vector<128x128xf32>
      %c0_14 = arith.constant 0 : index
      %c0_15 = arith.constant 0 : index
      %18 = vector.load %arg8[%c0_14, %c0_15] : memref<128x128xf32, #tpu.memory_space<vmem>>, vector<128x128xf32>
      tpu.vector_store %arg8[%c0_14, %c0_15], %17 {strides = array<i32>} : memref<128x128xf32, #tpu.memory_space<vmem>>, vector<128x128xf32>,
    } else {
    }
    %c0 = arith.constant 0 : index
    %c0_1 = arith.constant 0 : index
    %3 = vector.load %arg8[%c0, %c0_1] : memref<128x128xf32, #tpu.memory_space<vmem>>, vector<128x128xf32>
    %c0_2 = arith.constant 0 : index
    %c0_3 = arith.constant 0 : index
    %4 = vector.load %arg3[%c0_2, %c0_3] : memref<128x128xbf16, #tpu.memory_space<vmem>>, vector<128x128xbf16>
    %c0_4 = arith.constant 0 : index
    %c0_5 = arith.constant 0 : index
    %5 = vector.load %arg4[%c0_4, %c0_5] : memref<128x128xbf16, #tpu.memory_space<vmem>>, vector<128x128xbf16>
    %cst = arith.constant dense<0.000000e+00> : vector<128x128xf32>
    %6 = tpu.matmul %4, %5, %cst {dimension_numbers = #tpu.dot_dimension_numbers<[1], [0], [0], [1], [0, 0, 1, 1], [], []>} : vector<128x128xbf16>, vector<128x128xbf16>, vector<128x128xf32> -> vector<128x128xf32>
    %7 = arith.addf %3, %6 : vector<128x128xf32>
    %c0_6 = arith.constant 0 : index
    %c0_7 = arith.constant 0 : index
    %8 = vector.load %arg8[%c0_6, %c0_7] : memref<128x128xf32, #tpu.memory_space<vmem>>, vector<128x128xf32>
    tpu.vector_store %arg8[%c0_6, %c0_7], %7 {strides = array<i32>} : memref<128x128xf32, #tpu.memory_space<vmem>>, vector<128x128xf32>,
    %c0_i32_8 = arith.constant 0 : i32
    %9 = arith.cmpi eq, %arg1, %c0_i32_8 : i32
    %c0_i32_9 = arith.constant 0 : i32
    %10 = arith.cmpi eq, %arg2, %c0_i32_9 : i32
    %11 = arith.andi %9, %10 : i1
    %12 = arith.extui %11 : i1 to i32
    %c0_i32_10 = arith.constant 0 : i32
    %13 = arith.cmpi ne, %12, %c0_i32_10 : i32
    scf.if %13 {
      %cst_13 = arith.constant 0.000000e+00 : f32
      %17 = vector.broadcast %cst_13 : f32 to vector<1x8x128xf32>
      %c0_14 = arith.constant 0 : index
      %c0_15 = arith.constant 0 : index
      %c0_16 = arith.constant 0 : index
      %18 = vector.load %arg6[%c0_14, %c0_15, %c0_16] : memref<1x8x128xf32, #tpu.memory_space<vmem>>, vector<1x8x128xf32>
      tpu.vector_store %arg6[%c0_14, %c0_15, %c0_16], %17 {strides = array<i32>} : memref<1x8x128xf32, #tpu.memory_space<vmem>>, vector<1x8x128xf32>,
      %cst_17 = arith.constant 0.000000e+00 : f32
      %19 = vector.broadcast %cst_17 : f32 to vector<1x8x128xf32>
      %c0_18 = arith.constant 0 : index
      %c0_19 = arith.constant 0 : index
      %c0_20 = arith.constant 0 : index
      %20 = vector.load %arg7[%c0_18, %c0_19, %c0_20] : memref<1x8x128xf32, #tpu.memory_space<vmem>>, vector<1x8x128xf32>
      tpu.vector_store %arg7[%c0_18, %c0_19, %c0_20], %19 {strides = array<i32>} : memref<1x8x128xf32, #tpu.memory_space<vmem>>, vector<1x8x128xf32>,
    } else {
    }
    %c0_i32_11 = arith.constant 0 : i32
    %14 = arith.cmpi eq, %arg2, %c0_i32_11 : i32
    %15 = arith.extui %14 : i1 to i32
    %c0_i32_12 = arith.constant 0 : i32
    %16 = arith.cmpi ne, %15, %c0_i32_12 : i32
    scf.if %16 {
      %c0_13 = arith.constant 0 : index
      %c0_14 = arith.constant 0 : index
      %17 = vector.load %arg8[%c0_13, %c0_14] : memref<128x128xf32, #tpu.memory_space<vmem>>, vector<128x128xf32>
      %c0_15 = arith.constant 0 : index
      %c0_16 = arith.constant 0 : index
      %18 = vector.load %arg5[%c0_15, %c0_16] : memref<128x128xf32, #tpu.memory_space<vmem>>, vector<128x128xf32>
      tpu.vector_store %arg5[%c0_15, %c0_16], %17 {strides = array<i32>} : memref<128x128xf32, #tpu.memory_space<vmem>>, vector<128x128xf32>,
      %cst_17 = arith.constant dense<0.000000e+00> : vector<128xf32>
      %19 = vector.multi_reduction <add>, %17, %cst_17 [0] : vector<128x128xf32> to vector<128xf32>
      %20 = vector.shape_cast %19 : vector<128xf32> to vector<1x128xf32>
      %21 = arith.mulf %17, %17 : vector<128x128xf32>
      %cst_18 = arith.constant dense<0.000000e+00> : vector<128xf32>
      %22 = vector.multi_reduction <add>, %21, %cst_18 [0] : vector<128x128xf32> to vector<128xf32>
      %23 = vector.shape_cast %22 : vector<128xf32> to vector<1x128xf32>
      %c0_19 = arith.constant 0 : index
      %c0_20 = arith.constant 0 : index
      %c0_21 = arith.constant 0 : index
      %24 = vector.load %arg6[%c0_19, %c0_20, %c0_21] : memref<1x8x128xf32, #tpu.memory_space<vmem>>, vector<1x8x128xf32>
      %25 = vector.shape_cast %20 : vector<1x128xf32> to vector<1x1x128xf32>
      %26 = vector.broadcast %25 : vector<1x1x128xf32> to vector<1x8x128xf32>
      %27 = arith.addf %24, %26 : vector<1x8x128xf32>
      %c0_22 = arith.constant 0 : index
      %c0_23 = arith.constant 0 : index
      %c0_24 = arith.constant 0 : index
      %28 = vector.load %arg6[%c0_22, %c0_23, %c0_24] : memref<1x8x128xf32, #tpu.memory_space<vmem>>, vector<1x8x128xf32>
      tpu.vector_store %arg6[%c0_22, %c0_23, %c0_24], %27 {strides = array<i32>} : memref<1x8x128xf32, #tpu.memory_space<vmem>>, vector<1x8x128xf32>,
      %c0_25 = arith.constant 0 : index
      %c0_26 = arith.constant 0 : index
      %c0_27 = arith.constant 0 : index
      %29 = vector.load %arg7[%c0_25, %c0_26, %c0_27] : memref<1x8x128xf32, #tpu.memory_space<vmem>>, vector<1x8x128xf32>
      %30 = vector.shape_cast %23 : vector<1x128xf32> to vector<1x1x128xf32>
      %31 = vector.broadcast %30 : vector<1x1x128xf32> to vector<1x8x128xf32>
      %32 = arith.addf %29, %31 : vector<1x8x128xf32>
      %c0_28 = arith.constant 0 : index
      %c0_29 = arith.constant 0 : index
      %c0_30 = arith.constant 0 : index
      %33 = vector.load %arg7[%c0_28, %c0_29, %c0_30] : memref<1x8x128xf32, #tpu.memory_space<vmem>>, vector<1x8x128xf32>
      tpu.vector_store %arg7[%c0_28, %c0_29, %c0_30], %32 {strides = array<i32>} : memref<1x8x128xf32, #tpu.memory_space<vmem>>, vector<1x8x128xf32>,
    } else {
    }
    return
  }
  func.func @transform_0(%arg0: i32, %arg1: i32, %arg2: i32) -> (i32, i32) {
    %c2_i32 = arith.constant 2 : i32
    %0 = arith.muli %arg0, %c2_i32 : i32
    %1 = arith.addi %0, %arg1 : i32
    %c0_i32 = arith.constant 0 : i32
    return %1, %arg2 : i32, i32
  }
  func.func @transform_1(%arg0: i32, %arg1: i32, %arg2: i32) -> (i32, i32) {
    %c0_i32 = arith.constant 0 : i32
    %c0_i32_0 = arith.constant 0 : i32
    return %arg2, %c0_i32 : i32, i32
  }
  func.func @transform_2(%arg0: i32, %arg1: i32, %arg2: i32) -> (i32, i32) {
    %c2_i32 = arith.constant 2 : i32
    %0 = arith.muli %arg0, %c2_i32 : i32
    %1 = arith.addi %0, %arg1 : i32
    %c0_i32 = arith.constant 0 : i32
    %c0_i32_0 = arith.constant 0 : i32
    return %1, %c0_i32 : i32, i32
  }
  func.func @transform_3(%arg0: i32, %arg1: i32, %arg2: i32) -> (i32, i32, i32) {
    %c0_i32 = arith.constant 0 : i32
    %c0_i32_0 = arith.constant 0 : i32
    %c0_i32_1 = arith.constant 0 : i32
    return %arg0, %c0_i32, %c0_i32_0 : i32, i32, i32
  }
  func.func @transform_4(%arg0: i32, %arg1: i32, %arg2: i32) -> (i32, i32, i32) {
    %c0_i32 = arith.constant 0 : i32
    %c0_i32_0 = arith.constant 0 : i32
    %c0_i32_1 = arith.constant 0 : i32
    return %arg0, %c0_i32, %c0_i32_0 : i32, i32, i32
  }
}

module attributes {stable_mosaic.version = 11 : i64} {
  func.func @_normalize_kernel(%arg0: i32, %arg1: memref<128x128xf32, #tpu.memory_space<vmem>>, %arg2: memref<1x128xf32, #tpu.memory_space<vmem>>, %arg3: memref<1x128xf32, #tpu.memory_space<vmem>>, %arg4: memref<128x128xf32, #tpu.memory_space<vmem>>) attributes {dimension_semantics = [#tpu.dimension_semantics<parallel>], iteration_bounds = array<i64: 4>, scalar_prefetch = 0 : i64, scratch_operands = 0 : i64, tpu.core_type = #tpu.core_type<tc>, window_params = [{transform_indices = @transform_0, window_bounds = array<i64: 128, 128>}, {pipeline_mode = #tpu.pipeline_mode<synchronous>, transform_indices = @transform_1, window_bounds = array<i64: 1, 128>}, {pipeline_mode = #tpu.pipeline_mode<synchronous>, transform_indices = @transform_2, window_bounds = array<i64: 1, 128>}, {transform_indices = @transform_3, window_bounds = array<i64: 128, 128>}]} {
    %c0 = arith.constant 0 : index
    %c0_0 = arith.constant 0 : index
    %0 = vector.load %arg1[%c0, %c0_0] : memref<128x128xf32, #tpu.memory_space<vmem>>, vector<128x128xf32>
    %c0_1 = arith.constant 0 : index
    %c0_2 = arith.constant 0 : index
    %1 = vector.load %arg2[%c0_1, %c0_2] : memref<1x128xf32, #tpu.memory_space<vmem>>, vector<1x128xf32>
    %2 = vector.broadcast %1 : vector<1x128xf32> to vector<128x128xf32>
    %3 = arith.mulf %0, %2 : vector<128x128xf32>
    %c0_3 = arith.constant 0 : index
    %c0_4 = arith.constant 0 : index
    %4 = vector.load %arg3[%c0_3, %c0_4] : memref<1x128xf32, #tpu.memory_space<vmem>>, vector<1x128xf32>
    %5 = vector.broadcast %4 : vector<1x128xf32> to vector<128x128xf32>
    %6 = arith.addf %3, %5 : vector<128x128xf32>
    %c0_5 = arith.constant 0 : index
    %c0_6 = arith.constant 0 : index
    %7 = vector.load %arg4[%c0_5, %c0_6] : memref<128x128xf32, #tpu.memory_space<vmem>>, vector<128x128xf32>
    tpu.vector_store %arg4[%c0_5, %c0_6], %6 {strides = array<i32>} : memref<128x128xf32, #tpu.memory_space<vmem>>, vector<128x128xf32>,
    return
  }
  func.func @transform_0(%arg0: i32) -> (i32, i32) {
    %c0_i32 = arith.constant 0 : i32
    %c0_i32_0 = arith.constant 0 : i32
    return %arg0, %c0_i32 : i32, i32
  }
  func.func @transform_1(%arg0: i32) -> (i32, i32) {
    %c0_i32 = arith.constant 0 : i32
    %c0_i32_0 = arith.constant 0 : i32
    %c0_i32_1 = arith.constant 0 : i32
    return %c0_i32, %c0_i32_0 : i32, i32
  }
  func.func @transform_2(%arg0: i32) -> (i32, i32) {
    %c0_i32 = arith.constant 0 : i32
    %c0_i32_0 = arith.constant 0 : i32
    %c0_i32_1 = arith.constant 0 : i32
    return %c0_i32, %c0_i32_0 : i32, i32
  }
  func.func @transform_3(%arg0: i32) -> (i32, i32) {
    %c0_i32 = arith.constant 0 : i32
    %c0_i32_0 = arith.constant 0 : i32
    return %arg0, %c0_i32 : i32, i32
  }
}

</mosaic_0001>

<bundles_post_ra>
// kernel: _lambda_.3
= control target key start
LH: loop header
LB: loop body
LE: loop exit
PB: predicated region body
PF: predicated region fallthrough
CT: control target
= control target key end

     0   :  { %s357_s12 = smov 0   ;;  %s416_s0 = inlined_call_operand.vmem [shape: f32[512,128], index: 0, kind: input, shape index: {}, may-alias: {0,3}]   ;;  %s417_s1 = inlined_call_operand.vmem [shape: f32[1,128], index: 1, kind: input, shape index: {}]   ;;  %s418_s2 = inlined_call_operand.vmem [shape: f32[1,128], index: 2, kind: input, shape index: {}]   ;;  %s419_s3 = inlined_call_operand.vmem [shape: f32[512,128], index: 3, kind: output, shape index: {}, may-alias: {0,3}]  }
   0x1 LB: > { %s308_s13 = sadd.s32 4294967295, %s335_s12   ;;  %p312_p0 = scmp.ge.s32.totalorder %s335_s12, 1  ;;  %s335_s12 = sphi %s357_s12, %s13_s12  }
   0x2   : > { %p138_p1 = scmp.lt.s32.totalorder %s335_s12, 5 }
   0x4   : > { %p139_p2 = pnand %p312_p0, %p138_p1 }
   0x5   : > { %s313_s14 = sshll.u32 (!%p139_p2), %s308_s13, 4 }
   0x6   : > { %142 = sbr.rel (%p139_p2) target bundleno = 30 (0x1e), region = 32  ;;  %p163_p3 = scmp.lt.s32.totalorder (!%p139_p2), %s313_s14, 63 }
   0xb   : > { %s421_s14 = smov (!%p163_p3, %s313_s14), 63  ;;  %v317_v0 = vld [vmem:[%s417_s1] ss:$0 sm:$0xff] }
   0xc   : > { %s314_s15 = sshll.u32 %s421_s14, 3  ;;  %v318_v1 = vld [vmem:[%s418_s2] ss:$0 sm:$0xff] }
   0xd   : > { %s371_s20 = scalar_lea.vmem %s416_s0, %s314_s15  ;;  %s388_s25 = scalar_lea.vmem %s419_s3, %s314_s15 }
   0xe   : > { %v174_v2 = vld [vmem:[%s371_s20] sm:$0xff]  ;;  %v175_v3 = vld [vmem:[%s371_s20 + $0x8] sm:$0xff]  ;;  %v176_v4 = vld [vmem:[%s371_s20 + $0x10] sm:$0xff] }
   0xf   : > { %v177_v5 = vld [vmem:[%s371_s20 + $0x18] sm:$0xff]  ;;  %v178_v6 = vld [vmem:[%s371_s20 + $0x20] sm:$0xff]  ;;  %v179_v7 = vld [vmem:[%s371_s20 + $0x28] sm:$0xff]  ;;  %v197_v8 = vmul.f32 %v317_v0, %v174_v2  ;;  %v198_v9 = vmul.f32 %v317_v0, %v175_v3  ;;  %v199_v10 = vmul.f32 %v317_v0, %v176_v4 }
  0x10   : > { %v180_v11 = vld [vmem:[%s371_s20 + $0x30] sm:$0xff]  ;;  %v181_v12 = vld [vmem:[%s371_s20 + $0x38] sm:$0xff]  ;;  %v182_v13 = vld [vmem:[%s371_s20 + $0x40] sm:$0xff]  ;;  %v200_v14 = vmul.f32 %v317_v0, %v177_v5  ;;  %v201_v15 = vmul.f32 %v317_v0, %v178_v6  ;;  %v202_v16 = vmul.f32 %v317_v0, %v179_v7 }
  0x11   : > { %v183_v17 = vld [vmem:[%s371_s20 + $0x48] sm:$0xff]  ;;  %v184_v18 = vld [vmem:[%s371_s20 + $0x50] sm:$0xff]  ;;  %v185_v19 = vld [vmem:[%s371_s20 + $0x58] sm:$0xff]  ;;  %v203_v20 = vmul.f32 %v317_v0, %v180_v11  ;;  %v204_v21 = vmul.f32 %v317_v0, %v181_v12  ;;  %v205_v22 = vmul.f32 %v317_v0, %v182_v13  ;;  %v220_v23 = vadd.f32 %v318_v1, %v197_v8 }
  0x12   : > { %v186_v24 = vld [vmem:[%s371_s20 + $0x60] sm:$0xff]  ;;  %v187_v25 = vld [vmem:[%s371_s20 + $0x68] sm:$0xff]  ;;  %v188_v26 = vld [vmem:[%s371_s20 + $0x70] sm:$0xff]  ;;  %v206_v27 = vmul.f32 %v317_v0, %v183_v17  ;;  %v207_v28 = vmul.f32 %v317_v0, %v184_v18  ;;  %v208_v29 = vmul.f32 %v317_v0, %v185_v19  ;;  %v221_v30 = vadd.f32 %v318_v1, %v198_v9 }
  0x13   : > { %v189_v31 = vld [vmem:[%s371_s20 + $0x78] sm:$0xff]  ;;  %v209_v32 = vmul.f32 %v317_v0, %v186_v24  ;;  %v210_v33 = vmul.f32 %v317_v0, %v187_v25  ;;  %v211_v34 = vmul.f32 %v317_v0, %v188_v26  ;;  %v222_v35 = vadd.f32 %v318_v1, %v199_v10 }
  0x14   : > { %v212_v36 = vmul.f32 %v317_v0, %v189_v31  ;;  %v223_v37 = vadd.f32 %v318_v1, %v200_v14  ;;  %v224_v38 = vadd.f32 %v318_v1, %v201_v15  ;;  %v225_v39 = vadd.f32 %v318_v1, %v202_v16  ;;  %236 = vst [vmem:[%s388_s25] sm:$0xff] %v220_v23 }
  0x15   : > { %237 = vst [vmem:[%s388_s25 + $0x8] sm:$0xff] %v221_v30  ;;  %v226_v40 = vadd.f32 %v318_v1, %v203_v20  ;;  %v227_v41 = vadd.f32 %v318_v1, %v204_v21  ;;  %v228_v42 = vadd.f32 %v318_v1, %v205_v22  ;;  %v229_v43 = vadd.f32 %v318_v1, %v206_v27 }
  0x16   : > { %238 = vst [vmem:[%s388_s25 + $0x10] sm:$0xff] %v222_v35  ;;  %v230_v44 = vadd.f32 %v318_v1, %v207_v28  ;;  %v231_v45 = vadd.f32 %v318_v1, %v208_v29  ;;  %v232_v46 = vadd.f32 %v318_v1, %v209_v32  ;;  %v233_v47 = vadd.f32 %v318_v1, %v210_v33 }
  0x17   : > { %239 = vst [vmem:[%s388_s25 + $0x18] sm:$0xff] %v223_v37  ;;  %240 = vst [vmem:[%s388_s25 + $0x20] sm:$0xff] %v224_v38  ;;  %v234_v48 = vadd.f32 %v318_v1, %v211_v34  ;;  %v235_v49 = vadd.f32 %v318_v1, %v212_v36 }
  0x18   : > { %241 = vst [vmem:[%s388_s25 + $0x28] sm:$0xff] %v225_v39  ;;  %242 = vst [vmem:[%s388_s25 + $0x30] sm:$0xff] %v226_v40 }
  0x19   : > { %243 = vst [vmem:[%s388_s25 + $0x38] sm:$0xff] %v227_v41  ;;  %244 = vst [vmem:[%s388_s25 + $0x40] sm:$0xff] %v228_v42 }
  0x1a   : > { %245 = vst [vmem:[%s388_s25 + $0x48] sm:$0xff] %v229_v43  ;;  %246 = vst [vmem:[%s388_s25 + $0x50] sm:$0xff] %v230_v44 }
  0x1b   : > { %247 = vst [vmem:[%s388_s25 + $0x58] sm:$0xff] %v231_v45  ;;  %248 = vst [vmem:[%s388_s25 + $0x60] sm:$0xff] %v232_v46 }
  0x1c   : > { %249 = vst [vmem:[%s388_s25 + $0x68] sm:$0xff] %v233_v47  ;;  %250 = vst [vmem:[%s388_s25 + $0x70] sm:$0xff] %v234_v48 }
  0x1d   : > { %251 = vst [vmem:[%s388_s25 + $0x78] sm:$0xff] %v235_v49 }
  0x1e PF: > { %s13_s12 = sadd.s32 1, %s335_s12  }
  0x1f   : > { %p10_p4 = scmp.ge.s32.totalorder %s13_s12, 6  }
  0x21   :  { %12 = sbr.rel (!%p10_p4) target bundleno = 1 (0x1), region = 62 }

// kernel: _lambda_.2
= control target key start
LH: loop header
LB: loop body
LE: loop exit
PB: predicated region body
PF: predicated region fallthrough
CT: control target
= control target key end

     0   :  { %s1081_s15 = smov 0   ;;  %s1083_s16 = smov 0   ;;  %s1206_s0 = inlined_call_operand.vmem [shape: bf16[512,128], index: 0, kind: input, shape index: {}]   ;;  %s1207_s1 = inlined_call_operand.vmem [shape: bf16[128,128], index: 1, kind: input, shape index: {}]   ;;  %s1208_s2 = inlined_call_operand.vmem [shape: f32[512,128], index: 2, kind: output, shape index: {0}]   ;;  %s1209_s3 = inlined_call_operand.vmem [shape: f32[2,8,128], index: 3, kind: output, shape index: {1}]   ;;  %s1210_s4 = inlined_call_operand.vmem [shape: f32[2,8,128], index: 4, kind: output, shape index: {2}]  }
   0x1   :  { %s1085_s17 = smov 0   ;;  %s1087_s18 = smov 0  }
   0x2   :  { %s1089_s19 = smov 0  }
   0x3 LB: > { %s30_s20 = sadd.s32 1, %s1045_s17  ;;  %s34_s21 = sadd.s32 1, %s1049_s18  ;;  %s1053_s19 = sphi %s1089_s19, %s15_s19   ;;  %s1049_s18 = sphi %s1087_s18, %s1214_s18   ;;  %s1045_s17 = sphi %s1085_s17, %s1213_s17   ;;  %s1041_s16 = sphi %s1083_s16, %s1212_s16   ;;  %s1037_s15 = sphi %s1081_s15, %s1211_s15  }
   0x4   : > { %p32_p0 = scmp.ge.s32.totalorder %s30_s20, 2  ;;  %p864_p1 = scmp.ge.s32.totalorder %s1053_s19, 1 }
   0x5   : > { %p215_p2 = scmp.lt.s32.totalorder %s1053_s19, 5 }
   0x6   : > { %s1216_s20 = smov (%p32_p0, %s30_s20), 0  ;;  %s1218_s21 = smov (!%p32_p0, %s34_s21), %s1049_s18 }
   0x7   : > { %p216_p3 = pnand %p864_p1, %p215_p2  ;;  %p36_p4 = scmp.ge.s32.totalorder %s1218_s21, 2 }
   0x8   : > { %p290_p5 = scmp.lt.s32.totalorder (!%p216_p3), %s1041_s16, 1  ;;  %s865_s26 = sshll.u32 (!%p216_p3), %s1041_s16, 1 }
   0x9   : > { %s1220_s21 = smov (%p36_p4, %s1218_s21), 0  ;;  %219 = sbr.rel (%p216_p3) target bundleno = 303 (0x12f), region = 28 }
   0xa   : > { %s262_s27 = sadd.s32 (!%p216_p3), %s1037_s15, %s865_s26  ;;  %p592_p7 = scmp.eq.s32.totalorder (!%p216_p3), %s1037_s15, 0 }
   0xb   : > { %s866_s11 = sshll.u32 (!%p216_p3), %s262_s27, 4 }
   0xc   : > { %p264_p6 = scmp.lt.s32.totalorder (!%p216_p3), %s866_s11, 63 }
   0xe   : > { %v999_v0 = vld [vmem:[%s1207_s1 + $0x38] sm:$0xff]   ;;  %v1000_v1 = vld [vmem:[%s1207_s1 + $0x30] sm:$0xff]   ;;  %s1222_s16 = smov (!%p290_p5, %s1041_s16), 1  ;;  %v1001_v2 = vld [vmem:[%s1207_s1 + $0x28] sm:$0xff]   ;;  %s1224_s11 = smov (!%p264_p6, %s866_s11), 63  ;;  %v1055_v32 = vmov (%p592_p7), 0.0  }
   0xf   : > { %909 = vmatprep.subr.bf16.mxu0 %v999_v0  ;;  %941 = vmatprep.subr.bf16.mxu1 %v999_v0  ;;  %s871_s28 = sshll.u32 %s1222_s16, 3  ;;  %v1002_v3 = vld [vmem:[%s1207_s1 + $0x20] sm:$0xff]   ;;  %s867_s14 = sshll.u32 %s1224_s11, 2  ;;  %v1003_v4 = vld [vmem:[%s1207_s1 + $0x18] sm:$0xff]   ;;  %v1004_v7 = vld [vmem:[%s1207_s1 + $0x10] sm:$0xff]  }
  0x10   : > { %910 = vmatpush3.bf16.msra.mxu0 %v999_v0  ;;  %949 = vmatpush3.bf16.msra.mxu1 %v999_v0  ;;  %s1126_s7 = scalar_lea.vmem %s1209_s3, %s871_s28  ;;  %s1131_s10 = scalar_lea.vmem %s1210_s4, %s871_s28  ;;  %v1005_v8 = vld [vmem:[%s1207_s1 + $0x8] sm:$0xff]   ;;  %v1006_v9 = vld [vmem:[%s1207_s1] sm:$0xff]  }
  0x11   : > { %911 = vmatprep.subr.bf16.mxu0 %v1000_v1  ;;  %942 = vmatprep.subr.bf16.mxu1 %v1000_v1  ;;  %s870_s16 = sshll.u32 %s1224_s11, 3  ;;  %s1142_s26 = scalar_lea.vmem %s1206_s0, %s867_s14  ;;  %597 = vst [vmem:[%s1126_s7] sm:$0xff] (%p592_p7), %v1055_v32  ;;  %598 = vst [vmem:[%s1131_s10] sm:$0xff] (%p592_p7), %v1055_v32 }
  0x12   : > { %s1147_s29 = scalar_lea.vmem %s1208_s2, %s870_s16  ;;  %v1007_v5 = vld [vmem:[%s1142_s26] sm:$0xff]   ;;  %v1009_v10 = vld [vmem:[%s1142_s26 + $0x8] sm:$0xff]   ;;  %v1011_v12 = vld [vmem:[%s1142_s26 + $0x10] sm:$0xff]  }
  0x13   : > { %v1008_v6 = vld [vmem:[%s1142_s26 + $0x20] sm:$0xff]   ;;  %925 = vmatprep.mubr.bf16.mxu0 %v1007_v5  ;;  %v1010_v11 = vld [vmem:[%s1142_s26 + $0x28] sm:$0xff]   ;;  %v1012_v13 = vld [vmem:[%s1142_s26 + $0x30] sm:$0xff]  }
  0x14   : > { %912 = vmatpush3.bf16.msra.mxu0 %v1000_v1  ;;  %950 = vmatpush3.bf16.msra.mxu1 %v1000_v1  ;;  %v1013_v14 = vld [vmem:[%s1142_s26 + $0x18] sm:$0xff]  }
  0x15   : > { %913 = vmatprep.subr.bf16.mxu0 %v1001_v2  ;;  %943 = vmatprep.subr.bf16.mxu1 %v1001_v2  ;;  %v1014_v15 = vld [vmem:[%s1142_s26 + $0x38] sm:$0xff]  }
  0x16   : > { %933 = vmatprep.mubr.bf16.mxu1 %v1008_v6 }
  0x18   : > { %914 = vmatpush3.bf16.msra.mxu0 %v1001_v2  ;;  %951 = vmatpush3.bf16.msra.mxu1 %v1001_v2 }
  0x19   : > { %915 = vmatprep.subr.bf16.mxu0 %v1002_v3  ;;  %944 = vmatprep.subr.bf16.mxu1 %v1002_v3 }
  0x1c   : > { %916 = vmatpush3.bf16.msra.mxu0 %v1002_v3  ;;  %952 = vmatpush3.bf16.msra.mxu1 %v1002_v3 }
  0x1d   : > { %917 = vmatprep.subr.bf16.mxu0 %v1003_v4  ;;  %945 = vmatprep.subr.bf16.mxu1 %v1003_v4 }
  0x20   : > { %918 = vmatpush3.bf16.msra.mxu0 %v1003_v4  ;;  %953 = vmatpush3.bf16.msra.mxu1 %v1003_v4 }
  0x21   : > { %919 = vmatprep.subr.bf16.mxu0 %v1004_v7  ;;  %946 = vmatprep.subr.bf16.mxu1 %v1004_v7 }
  0x24   : > { %920 = vmatpush3.bf16.msra.mxu0 %v1004_v7  ;;  %954 = vmatpush3.bf16.msra.mxu1 %v1004_v7 }
  0x25   : > { %921 = vmatprep.subr.bf16.mxu0 %v1005_v8  ;;  %947 = vmatprep.subr.bf16.mxu1 %v1005_v8 }
  0x28   : > { %922 = vmatpush3.bf16.msra.mxu0 %v1005_v8  ;;  %955 = vmatpush3.bf16.msra.mxu1 %v1005_v8 }
  0x29   : > { %923 = vmatprep.subr.bf16.mxu0 %v1006_v9  ;;  %948 = vmatprep.subr.bf16.mxu1 %v1006_v9 }
  0x2c   : > { %924 = vmatpush3.bf16.msra.mxu0 %v1006_v9  ;;  %956 = vmatpush3.bf16.msra.mxu1 %v1006_v9 }
  0x2f   : > { %926 = vmatmul.mubr.bf16.vlgmr.msra.gmra.mxu0 %v1009_v10  ;;  %934 = vmatmul.mubr.bf16.vlgmr.msra.gmra.mxu1 %v1010_v11 }
  0x30   : > { %929 = vmatprep.mubr.bf16.mxu0 %v1011_v12  ;;  %937 = vmatprep.mubr.bf16.mxu1 %v1012_v13 }
  0x37   : > { %930 = vmatmul.mubr.bf16.gmra.mxu0 %v1013_v14  ;;  %938 = vmatmul.mubr.bf16.gmra.mxu1 %v1014_v15 }
  0xef   : > { %v927_v16 = vpop.f32.mrf.mxu0  ;;  %v935_v17 = vpop.f32.mrf.mxu1 }
  0xf0   : > { %578 = vst [vmem:[#allocation2 + $0x58] sm:$0xff] %v927_v16  ;;  %586 = vst [vmem:[#allocation2 + $0x10] sm:$0xff] %v935_v17 }
  0xf1   : > { %v497_v18 = vpop.f32.mrf.mxu0  ;;  %v529_v19 = vpop.f32.mrf.mxu1 }
  0xf2   : > { %576 = vst [vmem:[#allocation2 + $0x30] sm:$0xff] %v497_v18  ;;  %584 = vst [vmem:[#allocation2 + $0x40] sm:$0xff] %v529_v19 }
  0xf3   : > { %v928_v20 = vpop.f32.mrf.mxu0  ;;  %v936_v21 = vpop.f32.mrf.mxu1 }
  0xf4   : > { %579 = vst [vmem:[#allocation2 + $0x18] sm:$0xff] %v928_v20  ;;  %587 = vst [vmem:[#allocation2 + $0x38] sm:$0xff] %v936_v21 }
  0xf5   : > { %v500_v22 = vpop.f32.mrf.mxu0  ;;  %v532_v23 = vpop.f32.mrf.mxu1 }
  0xf6   : > { %577 = vst [vmem:[#allocation2] sm:$0xff] %v500_v22  ;;  %585 = vst [vmem:[#allocation2 + $0x20] sm:$0xff] %v532_v23 }
  0xf7   : > { %v931_v24 = vpop.f32.mrf.mxu0  ;;  %v939_v25 = vpop.f32.mrf.mxu1 }
  0xf8   : > { %582 = vst [vmem:[#allocation2 + $0x8] sm:$0xff] %v931_v24  ;;  %590 = vst [vmem:[#allocation2 + $0x78] sm:$0xff] %v939_v25 }
  0xf9   : > { %v513_v26 = vpop.f32.mrf.mxu0  ;;  %v545_v27 = vpop.f32.mrf.mxu1 }
  0xfa   : > { %580 = vst [vmem:[#allocation2 + $0x50] sm:$0xff] %v513_v26  ;;  %588 = vst [vmem:[#allocation2 + $0x60] sm:$0xff] %v545_v27  ;;  %596 = sbr.rel (!%p592_p7) target bundleno = 255 (0xff), region = 36 }
  0xfb   : > { %v932_v28 = vpop.f32.mrf.mxu0  ;;  %v940_v29 = vpop.f32.mrf.mxu1 }
  0xfc   : > { %583 = vst [vmem:[#allocation2 + $0x48] sm:$0xff] %v932_v28  ;;  %591 = vst [vmem:[#allocation2 + $0x28] sm:$0xff] %v940_v29 }
  0xfd   : > { %v516_v30 = vpop.f32.mrf.mxu0  ;;  %v548_v31 = vpop.f32.mrf.mxu1 }
  0xfe   : > { %581 = vst [vmem:[#allocation2 + $0x68] sm:$0xff] %v516_v30  ;;  %589 = vst [vmem:[#allocation2 + $0x70] sm:$0xff] %v548_v31 }
  0xff PF: > { %v602_v33 = vld [vmem:[#allocation2 + $0x30] sm:$0xff]  ;;  %v603_v34 = vld [vmem:[#allocation2] sm:$0xff]  ;;  %v604_v35 = vld [vmem:[#allocation2 + $0x58] sm:$0xff] }
 0x100   : > { %618 = vst [vmem:[%s1147_s29] sm:$0xff] %v602_v33  ;;  %v655_v36 = vmul.f32 %v602_v33, %v602_v33  ;;  %619 = vst [vmem:[%s1147_s29 + $0x8] sm:$0xff] %v603_v34  ;;  %v634_v37 = vadd.f32 %v603_v34, %v602_v33  ;;  %v656_v38 = vmul.f32 %v603_v34, %v603_v34  ;;  %v605_v40 = vld [vmem:[#allocation2 + $0x18] sm:$0xff]  ;;  %v608_v43 = vld [vmem:[#allocation2 + $0x8] sm:$0xff] }
 0x101   : > { %620 = vst [vmem:[%s1147_s29 + $0x10] sm:$0xff] %v604_v35  ;;  %v657_v39 = vmul.f32 %v604_v35, %v604_v35  ;;  %v606_v41 = vld [vmem:[#allocation2 + $0x50] sm:$0xff]  ;;  %621 = vst [vmem:[%s1147_s29 + $0x18] sm:$0xff] %v605_v40  ;;  %v610_v45 = vld [vmem:[#allocation2 + $0x40] sm:$0xff]  ;;  %v658_v48 = vmul.f32 %v605_v40, %v605_v40  ;;  %v661_v0 = vmul.f32 %v608_v43, %v608_v43 }
 0x102   : > { %622 = vst [vmem:[%s1147_s29 + $0x20] sm:$0xff] %v606_v41  ;;  %v671_v46 = vadd.f32 %v656_v38, %v655_v36  ;;  %v635_v47 = vadd.f32 %v634_v37, %v604_v35  ;;  %624 = vst [vmem:[%s1147_s29 + $0x30] sm:$0xff] %v608_v43  ;;  %v611_v49 = vld [vmem:[#allocation2 + $0x20] sm:$0xff]  ;;  %v612_v50 = vld [vmem:[#allocation2 + $0x10] sm:$0xff]  ;;  %v659_v57 = vmul.f32 %v606_v41, %v606_v41 }
 0x103   : > { %v609_v44 = vld [vmem:[#allocation2 + $0x48] sm:$0xff]  ;;  %626 = vst [vmem:[%s1147_s29 + $0x40] sm:$0xff] %v610_v45  ;;  %v613_v51 = vld [vmem:[#allocation2 + $0x38] sm:$0xff]  ;;  %627 = vst [vmem:[%s1147_s29 + $0x48] sm:$0xff] %v611_v49  ;;  %v663_v6 = vmul.f32 %v610_v45, %v610_v45  ;;  %v664_v9 = vmul.f32 %v611_v49, %v611_v49  ;;  %v665_v12 = vmul.f32 %v612_v50, %v612_v50 }
 0x104   : > { %625 = vst [vmem:[%s1147_s29 + $0x38] sm:$0xff] %v609_v44  ;;  %628 = vst [vmem:[%s1147_s29 + $0x50] sm:$0xff] %v612_v50  ;;  %v614_v52 = vld [vmem:[#allocation2 + $0x60] sm:$0xff]  ;;  %v616_v54 = vld [vmem:[#allocation2 + $0x78] sm:$0xff]  ;;  %v672_v55 = vadd.f32 %v671_v46, %v657_v39  ;;  %v636_v56 = vadd.f32 %v635_v47, %v605_v40  ;;  %v662_v3 = vmul.f32 %v609_v44, %v609_v44 }
 0x105   : > { %v607_v42 = vld [vmem:[#allocation2 + $0x68] sm:$0xff]  ;;  %629 = vst [vmem:[%s1147_s29 + $0x58] sm:$0xff] %v613_v51  ;;  %v615_v53 = vld [vmem:[#allocation2 + $0x70] sm:$0xff]  ;;  %630 = vst [vmem:[%s1147_s29 + $0x60] sm:$0xff] %v614_v52  ;;  %v666_v15 = vmul.f32 %v613_v51, %v613_v51  ;;  %v667_v18 = vmul.f32 %v614_v52, %v614_v52  ;;  %v669_v24 = vmul.f32 %v616_v54, %v616_v54 }
 0x106   : > { %623 = vst [vmem:[%s1147_s29 + $0x28] sm:$0xff] %v607_v42  ;;  %631 = vst [vmem:[%s1147_s29 + $0x68] sm:$0xff] %v615_v53  ;;  %v617_v58 = vld [vmem:[#allocation2 + $0x28] sm:$0xff]  ;;  %v673_v59 = vadd.f32 %v672_v55, %v658_v48  ;;  %v637_v60 = vadd.f32 %v636_v56, %v606_v41  ;;  %v660_v61 = vmul.f32 %v607_v42, %v607_v42  ;;  %v692_v40 = vld [vmem:[%s1126_s7] sm:$0xff] }
 0x107   : > { %632 = vst [vmem:[%s1147_s29 + $0x70] sm:$0xff] %v616_v54  ;;  %633 = vst [vmem:[%s1147_s29 + $0x78] sm:$0xff] %v617_v58  ;;  %v668_v21 = vmul.f32 %v615_v53, %v615_v53  ;;  %v670_v27 = vmul.f32 %v617_v58, %v617_v58 }
 0x108   : > { %v674_v62 = vadd.f32 %v673_v59, %v659_v57  ;;  %v638_v63 = vadd.f32 %v637_v60, %v607_v42 }
 0x10a   : > { %v675_v1 = vadd.f32 %v674_v62, %v660_v61  ;;  %v639_v2 = vadd.f32 %v638_v63, %v608_v43  ;;  %v695_v43 = vld [vmem:[%s1131_s10] sm:$0xff] }
 0x10c   : > { %v676_v4 = vadd.f32 %v675_v1, %v661_v0  ;;  %v640_v5 = vadd.f32 %v639_v2, %v609_v44 }
 0x10e   : > { %v677_v7 = vadd.f32 %v676_v4, %v662_v3  ;;  %v641_v8 = vadd.f32 %v640_v5, %v610_v45 }
 0x110   : > { %v678_v10 = vadd.f32 %v677_v7, %v663_v6  ;;  %v642_v11 = vadd.f32 %v641_v8, %v611_v49 }
 0x112   : > { %v679_v13 = vadd.f32 %v678_v10, %v664_v9  ;;  %v643_v14 = vadd.f32 %v642_v11, %v612_v50 }
 0x114   : > { %v680_v16 = vadd.f32 %v679_v13, %v665_v12  ;;  %v644_v17 = vadd.f32 %v643_v14, %v613_v51 }
 0x116   : > { %v681_v19 = vadd.f32 %v680_v16, %v666_v15  ;;  %v645_v20 = vadd.f32 %v644_v17, %v614_v52 }
 0x118   : > { %v682_v22 = vadd.f32 %v681_v19, %v667_v18  ;;  %v646_v23 = vadd.f32 %v645_v20, %v615_v53 }
 0x11a   : > { %v683_v25 = vadd.f32 %v682_v22, %v668_v21  ;;  %v647_v26 = vadd.f32 %v646_v23, %v616_v54 }
 0x11c   : > { %v684_v28 = vadd.f32 %v683_v25, %v669_v24  ;;  %v648_v29 = vadd.f32 %v647_v26, %v617_v58 }
 0x11e   : > { %v649_v30 = vrot.slane %v648_v29, 4  ;;  %v685_v31 = vadd.f32 %v684_v28, %v670_v27 }
 0x120   : > { %v650_v32 = vadd.f32 %v649_v30, %v648_v29  ;;  %v686_v33 = vrot.slane %v685_v31, 4 }
 0x122   : > { %v651_v34 = vrot.slane %v650_v32, 2  ;;  %v687_v35 = vadd.f32 %v686_v33, %v685_v31 }
 0x124   : > { %v652_v36 = vadd.f32 %v651_v34, %v650_v32  ;;  %v688_v37 = vrot.slane %v687_v35, 2 }
 0x126   : > { %v653_v38 = vrot.slane %v652_v36, 1  ;;  %v689_v39 = vadd.f32 %v688_v37, %v687_v35 }
 0x128   : > { %v654_v41 = vadd.f32 %v653_v38, %v652_v36  ;;  %v690_v42 = vrot.slane %v689_v39, 1 }
 0x12a   : > { %v693_v44 = vadd.f32 %v692_v40, %v654_v41  ;;  %v691_v45 = vadd.f32 %v690_v42, %v689_v39 }
 0x12c   : > { %694 = vst [vmem:[%s1126_s7] sm:$0xff] %v693_v44  ;;  %v696_v46 = vadd.f32 %v695_v43, %v691_v45 }
 0x12e   : > { %697 = vst [vmem:[%s1131_s10] sm:$0xff] %v696_v46 }
 0x12f PF: > { %s15_s19 = sadd.s32 1, %s1053_s19   ;;  %s1211_s15 = smov %s1045_s17 }
 0x130   : > { %p12_p8 = scmp.ge.s32.totalorder %s15_s19, 6   ;;  %s1212_s16 = smov %s1049_s18 }
 0x131   : > { %s1213_s17 = smov %s1216_s20  ;;  %s1214_s18 = smov %s1220_s21 }
 0x132   :  { %14 = sbr.rel (!%p12_p8) target bundleno = 3 (0x3), region = 97 }

</bundles_post_ra>
